<compile_context>
chip_gen: v7x
topology: tpu7x:2x2x1
jax: 0.10.0
libtpu: 0.0.40
codegen_flags: <defaults>
</compile_context>

<pallas_src>
import functools

import numpy as np

import jax
import jax.numpy as jnp
from jax.experimental import pallas as pl
from jax.experimental.pallas import tpu as pltpu


def _round_up(v, m):
    return ((v + m - 1) // m) * m


# ----------------------------------------------------------------------------- kernel
def _fused_lstm_kernel(x_ref, mask_ref, *refs, gate_lane, num_layers):
    """Fused LSTM stack: all layers x all directions in one kernel invocation.

    x_ref:    (N_pad, L)         bf16 input rows (all trials, valid or not)
    mask_ref: (N_pad, 1)         f32 0/1 row validity mask
    refs:     (w0, b0, w1, b1, ..., o_ref)
      w_l:    (in_dim, 3*G)      bf16, gate columns [ i(pad to G) | o(pad to G) | g(pad to G) ]
      b_l:    (1, 3*G)           f32, b_ih + b_hh in the same (padded) column order
    o_ref:    (N_pad, G)         f32, lanes [0:DH) = [h_fwd | h_rev], rest exactly zero
    """
    o_ref = refs[-1]
    wb = refs[:-1]
    G = gate_lane

    h_in = x_ref[...]                                    # bf16 (N, in_dim)
    h = None
    for layer in range(num_layers):
        w = wb[2 * layer][...]                           # (in_dim, 3*G) bf16
        b = wb[2 * layer + 1][...]                       # (1, 3*G) f32
        gates = jnp.dot(h_in, w, preferred_element_type=jnp.float32) + b
        # sigmoid(x) = 0.5*tanh(0.5*x) + 0.5 : single EUP push per element.
        # [i | o] slab is 2*G lanes (128-aligned); [g] slab is the last G lanes.
        sig = 0.5 * jnp.tanh(0.5 * gates[:, : 2 * G]) + 0.5
        g = jnp.tanh(gates[:, 2 * G:])
        c = sig[:, :G] * g                               # i * g        (c_prev == 0)
        h = sig[:, G:2 * G] * jnp.tanh(c)                # o * tanh(c); padded lanes are 0
        if layer + 1 < num_layers:
            h_in = h.astype(jnp.bfloat16)                # stays on-chip, feeds next layer

    # Zero invalid-trial / pad rows in-kernel (matches PyTorch zero-filled padded_batch),
    # then one full-width unmasked lane-dense store.
    o_ref[...] = (h * mask_ref[...]).astype(o_ref.dtype)


def _fused_lstm_stack(x_packed, mask, ws, bs, gate_lane):
    """One pallas_call for the whole (layers x directions) stack."""
    n_pad = x_packed.shape[0]
    num_layers = len(ws)

    args = [x_packed, mask]
    in_specs = [pl.BlockSpec(x_packed.shape, lambda i: (0, 0)),
                pl.BlockSpec(mask.shape, lambda i: (0, 0))]
    for w, b in zip(ws, bs):
        args += [w, b]
        in_specs += [pl.BlockSpec(w.shape, lambda i: (0, 0)),
                     pl.BlockSpec(b.shape, lambda i: (0, 0))]

    flops = int(sum(2 * n_pad * w.shape[0] * w.shape[1] for w in ws))
    transcendentals = int(num_layers * n_pad * 4 * gate_lane)   # tanh pushes (sigmoid via tanh)
    bytes_accessed = int(
        x_packed.size * 2 + mask.size * 4
        + sum(w.size * 2 + b.size * 4 for w, b in zip(ws, bs))
        + n_pad * gate_lane * 4)

    kernel = functools.partial(_fused_lstm_kernel, gate_lane=gate_lane, num_layers=num_layers)
    return pl.pallas_call(
        kernel,
        out_shape=jax.ShapeDtypeStruct((n_pad, gate_lane), jnp.float32),
        grid=(1,),  # tiny, latency/dispatch-bound: no tiling, no TC sharding
        in_specs=in_specs,
        out_specs=pl.BlockSpec((n_pad, gate_lane), lambda i: (0, 0)),
        compiler_params=pltpu.CompilerParams(dimension_semantics=("arbitrary",)),
        cost_estimate=pl.CostEstimate(flops=flops, transcendentals=transcendentals,
                                      bytes_accessed=bytes_accessed),
    )(*args)


# ----------------------------------------------------------------------------- params
def init_lstm_params(key, seq_length, hidden_size, num_layers, bidirectional):
    """Deterministic init mirroring nn.LSTM parameter shapes (uniform(-1/sqrt(H), 1/sqrt(H)))."""
    num_dirs = 2 if bidirectional else 1
    k = float(1.0 / (hidden_size ** 0.5))
    params = []
    for layer in range(num_layers):
        in_dim = seq_length if layer == 0 else hidden_size * num_dirs
        layer_params = []
        for _d in range(num_dirs):
            key, k1, k2, k3, k4 = jax.random.split(key, 5)
            w_ih = jax.random.uniform(k1, (4 * hidden_size, in_dim), jnp.float32, -k, k)
            # w_hh contributes 0 here (h0 == 0); kept only for shape fidelity.
            w_hh = jax.random.uniform(k2, (4 * hidden_size, hidden_size), jnp.float32, -k, k)
            b_ih = jax.random.uniform(k3, (4 * hidden_size,), jnp.float32, -k, k)
            b_hh = jax.random.uniform(k4, (4 * hidden_size,), jnp.float32, -k, k)
            layer_params.append((w_ih, w_hh, b_ih, b_hh))
        params.append(layer_params)
    return params


def fuse_lstm_params(params, hidden_size, num_dirs):
    """One-time weight prep (hoisted out of the forward path).

    Per layer: drop the forget gate (multiplies c0 == 0), transpose w_ih, fuse both
    directions, fold b_ih + b_hh, and lay gate columns out as 128-lane-aligned groups
    [ i(DH, zero-padded to G) | o(... to G) | g(... to G) ] so every in-kernel gate slice
    sits on a vreg lane-group boundary.  Layers >= 1 get zero weight rows [DH:G) so the
    G-wide hidden of the previous layer feeds straight through.  Weights bf16, biases f32.
    """
    H = hidden_size
    DH = num_dirs * H
    G = _round_up(max(DH, 128), 128)                      # padded per-gate lane group
    ws, bs = [], []
    for layer, layer_params in enumerate(params):
        in_dim_raw = layer_params[0][0].shape[1]          # L for layer 0, DH for layers >= 1
        in_dim = in_dim_raw if layer == 0 else G
        w = np.zeros((in_dim, 3 * G), np.float32)
        b = np.zeros((1, 3 * G), np.float32)
        for d, (w_ih, _w_hh, b_ih, b_hh) in enumerate(layer_params):
            bias = np.asarray(b_ih + b_hh)                # PyTorch row order: [i, f, g, o]
            w_ih = np.asarray(w_ih)
            col = d * H
            w[:in_dim_raw, 0 * G + col:0 * G + col + H] = w_ih[0 * H:1 * H].T   # i
            w[:in_dim_raw, 1 * G + col:1 * G + col + H] = w_ih[3 * H:4 * H].T   # o
            w[:in_dim_raw, 2 * G + col:2 * G + col + H] = w_ih[2 * H:3 * H].T   # g
            b[0, 0 * G + col:0 * G + col + H] = bias[0 * H:1 * H]
            b[0, 1 * G + col:1 * G + col + H] = bias[3 * H:4 * H]
            b[0, 2 * G + col:2 * G + col + H] = bias[2 * H:3 * H]
        ws.append(jnp.asarray(w).astype(jnp.bfloat16))    # (in_dim, 3*G)
        bs.append(jnp.asarray(b))                         # (1, 3*G) f32
    return tuple(ws), tuple(bs)


# ----------------------------------------------------------------------------- glue
@functools.partial(jax.jit, static_argnames=("num_trials", "hidden_size", "num_dirs"))
def lstm_network_forward(x, ws, bs, *, num_trials, hidden_size, num_dirs):
    """Reproduces LSTMnetwork.forward.

    x:          (batch, num_max_trials, num_channels, seq_length) float32
    num_trials: static Python tuple of ints, one per batch element
    returns:    (batch, num_max_trials, num_channels, hidden_size * num_dirs) float32,
                zero-filled for trials >= num_trials[b] (like the PyTorch padded_batch).
    """
    B, T_max, C, L = x.shape
    DH = hidden_size * num_dirs
    G = _round_up(max(DH, 128), 128)
    N = B * T_max * C
    N_pad = max(_round_up(N, 16), 16)                     # bf16 MXU LHS: 16-sublane aligned

    # Static 0/1 validity mask (trace-time constant): no row gathers / scatters at all.
    mask_np = np.zeros((N_pad, 1), np.float32)
    for b in range(B):
        for t in range(num_trials[b]):
            start = (b * T_max + t) * C
            mask_np[start:start + C, 0] = 1.0
    mask = jnp.asarray(mask_np)

    # All rows go through the kernel; invalid ones are zeroed in-kernel by the mask.
    x_flat = x.reshape(N, L).astype(jnp.bfloat16)
    if N_pad != N:
        x_flat = jnp.pad(x_flat, ((0, N_pad - N), (0, 0)))

    lstm_out = _fused_lstm_stack(x_flat, mask, ws, bs, G)  # (N_pad, G) f32
    return lstm_out[:N, :DH].reshape(B, T_max, C, DH)


# ----------------------------------------------------------------------------- main
if __name__ == "__main__":
    key = jax.random.PRNGKey(0)
    B, T_max, C, L = 2, 3, 4, 16
    hidden_size, num_layers, bidirectional = 32, 2, True
    num_dirs = 2 if bidirectional else 1
    num_trials = (3, 2)
    # TODO(synk): num_trials drives data-dependent output shapes in PyTorch; here it is
    # a static Python tuple since JAX/Pallas requires static shapes.

    kx, kp = jax.random.split(key)
    x = jax.random.normal(kx, (B, T_max, C, L), dtype=jnp.float32)
    raw_params = init_lstm_params(kp, L, hidden_size, num_layers, bidirectional)
    ws, bs = fuse_lstm_params(raw_params, hidden_size, num_dirs)   # weight prep once, at init

    out = lstm_network_forward(
        x, ws, bs, num_trials=num_trials, hidden_size=hidden_size, num_dirs=num_dirs)
    out = jax.block_until_ready(out)
    assert out.shape == (B, T_max, C, hidden_size * num_dirs)
    assert out.dtype == jnp.float32
    # Invalid trials must be zero-filled (patient 1 has only 2 of 3 trials).
    assert bool(jnp.all(out[1, num_trials[1]:] == 0.0))
    print("KERNEL_OK")
</pallas_src>

<mosaic_0001>
module attributes {stable_mosaic.version = 11 : i64} {
  func.func @_fused_lstm_kernel(%arg0: i32, %arg1: memref<32x16xbf16, #tpu.memory_space<vmem>>, %arg2: memref<32x1xf32, #tpu.memory_space<vmem>>, %arg3: memref<16x384xbf16, #tpu.memory_space<vmem>>, %arg4: memref<1x384xf32, #tpu.memory_space<vmem>>, %arg5: memref<128x384xbf16, #tpu.memory_space<vmem>>, %arg6: memref<1x384xf32, #tpu.memory_space<vmem>>, %arg7: memref<32x128xf32, #tpu.memory_space<vmem>>) attributes {dimension_semantics = [#tpu.dimension_semantics<arbitrary>], iteration_bounds = array<i64: 1>, scalar_prefetch = 0 : i64, scratch_operands = 0 : i64, tpu.core_type = #tpu.core_type<tc>, window_params = [{pipeline_mode = #tpu.pipeline_mode<synchronous>, transform_indices = @transform_0, window_bounds = array<i64: 32, 16>}, {pipeline_mode = #tpu.pipeline_mode<synchronous>, transform_indices = @transform_1, window_bounds = array<i64: 32, 1>}, {pipeline_mode = #tpu.pipeline_mode<synchronous>, transform_indices = @transform_2, window_bounds = array<i64: 16, 384>}, {pipeline_mode = #tpu.pipeline_mode<synchronous>, transform_indices = @transform_3, window_bounds = array<i64: 1, 384>}, {pipeline_mode = #tpu.pipeline_mode<synchronous>, transform_indices = @transform_4, window_bounds = array<i64: 128, 384>}, {pipeline_mode = #tpu.pipeline_mode<synchronous>, transform_indices = @transform_5, window_bounds = array<i64: 1, 384>}, {pipeline_mode = #tpu.pipeline_mode<synchronous>, transform_indices = @transform_6, window_bounds = array<i64: 32, 128>}]} {
    %c0 = arith.constant 0 : index
    %c0_0 = arith.constant 0 : index
    %0 = vector.load %arg1[%c0, %c0_0] : memref<32x16xbf16, #tpu.memory_space<vmem>>, vector<32x16xbf16>
    %c0_1 = arith.constant 0 : index
    %c0_2 = arith.constant 0 : index
    %1 = vector.load %arg3[%c0_1, %c0_2] : memref<16x384xbf16, #tpu.memory_space<vmem>>, vector<16x384xbf16>
    %c0_3 = arith.constant 0 : index
    %c0_4 = arith.constant 0 : index
    %2 = vector.load %arg4[%c0_3, %c0_4] : memref<1x384xf32, #tpu.memory_space<vmem>>, vector<1x384xf32>
    %cst = arith.constant dense<0.000000e+00> : vector<32x384xf32>
    %3 = tpu.matmul %0, %1, %cst {dimension_numbers = #tpu.dot_dimension_numbers<[1], [0], [0], [1], [0, 0, 1, 1], [], []>} : vector<32x16xbf16>, vector<16x384xbf16>, vector<32x384xf32> -> vector<32x384xf32>
    %4 = vector.broadcast %2 : vector<1x384xf32> to vector<32x384xf32>
    %5 = arith.addf %3, %4 : vector<32x384xf32>
    %6 = vector.extract_strided_slice %5 {offsets = [0, 0], sizes = [32, 256], strides = [1, 1]} : vector<32x384xf32> to vector<32x256xf32>
    %cst_5 = arith.constant 5.000000e-01 : f32
    %7 = vector.broadcast %cst_5 : f32 to vector<32x256xf32>
    %8 = arith.mulf %7, %6 : vector<32x256xf32>
    %9 = math.tanh %8 : vector<32x256xf32>
    %cst_6 = arith.constant 5.000000e-01 : f32
    %10 = vector.broadcast %cst_6 : f32 to vector<32x256xf32>
    %11 = arith.mulf %10, %9 : vector<32x256xf32>
    %cst_7 = arith.constant 5.000000e-01 : f32
    %12 = vector.broadcast %cst_7 : f32 to vector<32x256xf32>
    %13 = arith.addf %11, %12 : vector<32x256xf32>
    %14 = vector.extract_strided_slice %5 {offsets = [0, 256], sizes = [32, 128], strides = [1, 1]} : vector<32x384xf32> to vector<32x128xf32>
    %15 = math.tanh %14 : vector<32x128xf32>
    %16 = vector.extract_strided_slice %13 {offsets = [0, 0], sizes = [32, 128], strides = [1, 1]} : vector<32x256xf32> to vector<32x128xf32>
    %17 = arith.mulf %16, %15 : vector<32x128xf32>
    %18 = vector.extract_strided_slice %13 {offsets = [0, 128], sizes = [32, 128], strides = [1, 1]} : vector<32x256xf32> to vector<32x128xf32>
    %19 = math.tanh %17 : vector<32x128xf32>
    %20 = arith.mulf %18, %19 : vector<32x128xf32>
    %21 = arith.truncf %20 : vector<32x128xf32> to vector<32x128xbf16>
    %c0_8 = arith.constant 0 : index
    %c0_9 = arith.constant 0 : index
    %22 = vector.load %arg5[%c0_8, %c0_9] : memref<128x384xbf16, #tpu.memory_space<vmem>>, vector<128x384xbf16>
    %c0_10 = arith.constant 0 : index
    %c0_11 = arith.constant 0 : index
    %23 = vector.load %arg6[%c0_10, %c0_11] : memref<1x384xf32, #tpu.memory_space<vmem>>, vector<1x384xf32>
    %cst_12 = arith.constant dense<0.000000e+00> : vector<32x384xf32>
    %24 = tpu.matmul %21, %22, %cst_12 {dimension_numbers = #tpu.dot_dimension_numbers<[1], [0], [0], [1], [0, 0, 1, 1], [], []>} : vector<32x128xbf16>, vector<128x384xbf16>, vector<32x384xf32> -> vector<32x384xf32>
    %25 = vector.broadcast %23 : vector<1x384xf32> to vector<32x384xf32>
    %26 = arith.addf %24, %25 : vector<32x384xf32>
    %27 = vector.extract_strided_slice %26 {offsets = [0, 0], sizes = [32, 256], strides = [1, 1]} : vector<32x384xf32> to vector<32x256xf32>
    %cst_13 = arith.constant 5.000000e-01 : f32
    %28 = vector.broadcast %cst_13 : f32 to vector<32x256xf32>
    %29 = arith.mulf %28, %27 : vector<32x256xf32>
    %30 = math.tanh %29 : vector<32x256xf32>
    %cst_14 = arith.constant 5.000000e-01 : f32
    %31 = vector.broadcast %cst_14 : f32 to vector<32x256xf32>
    %32 = arith.mulf %31, %30 : vector<32x256xf32>
    %cst_15 = arith.constant 5.000000e-01 : f32
    %33 = vector.broadcast %cst_15 : f32 to vector<32x256xf32>
    %34 = arith.addf %32, %33 : vector<32x256xf32>
    %35 = vector.extract_strided_slice %26 {offsets = [0, 256], sizes = [32, 128], strides = [1, 1]} : vector<32x384xf32> to vector<32x128xf32>
    %36 = math.tanh %35 : vector<32x128xf32>
    %37 = vector.extract_strided_slice %34 {offsets = [0, 0], sizes = [32, 128], strides = [1, 1]} : vector<32x256xf32> to vector<32x128xf32>
    %38 = arith.mulf %37, %36 : vector<32x128xf32>
    %39 = vector.extract_strided_slice %34 {offsets = [0, 128], sizes = [32, 128], strides = [1, 1]} : vector<32x256xf32> to vector<32x128xf32>
    %40 = math.tanh %38 : vector<32x128xf32>
    %41 = arith.mulf %39, %40 : vector<32x128xf32>
    %c0_16 = arith.constant 0 : index
    %c0_17 = arith.constant 0 : index
    %42 = vector.load %arg2[%c0_16, %c0_17] : memref<32x1xf32, #tpu.memory_space<vmem>>, vector<32x1xf32>
    %43 = vector.broadcast %42 : vector<32x1xf32> to vector<32x128xf32>
    %44 = arith.mulf %41, %43 : vector<32x128xf32>
    %c0_18 = arith.constant 0 : index
    %c0_19 = arith.constant 0 : index
    %45 = vector.load %arg7[%c0_18, %c0_19] : memref<32x128xf32, #tpu.memory_space<vmem>>, vector<32x128xf32>
    tpu.vector_store %arg7[%c0_18, %c0_19], %44 {strides = array<i32>} : memref<32x128xf32, #tpu.memory_space<vmem>>, vector<32x128xf32>,
    return
  }
  func.func @transform_0(%arg0: i32) -> (i32, i32) {
    %c0_i32 = arith.constant 0 : i32
    %c0_i32_0 = arith.constant 0 : i32
    %c0_i32_1 = arith.constant 0 : i32
    return %c0_i32, %c0_i32_0 : i32, i32
  }
  func.func @transform_1(%arg0: i32) -> (i32, i32) {
    %c0_i32 = arith.constant 0 : i32
    %c0_i32_0 = arith.constant 0 : i32
    %c0_i32_1 = arith.constant 0 : i32
    return %c0_i32, %c0_i32_0 : i32, i32
  }
  func.func @transform_2(%arg0: i32) -> (i32, i32) {
    %c0_i32 = arith.constant 0 : i32
    %c0_i32_0 = arith.constant 0 : i32
    %c0_i32_1 = arith.constant 0 : i32
    return %c0_i32, %c0_i32_0 : i32, i32
  }
  func.func @transform_3(%arg0: i32) -> (i32, i32) {
    %c0_i32 = arith.constant 0 : i32
    %c0_i32_0 = arith.constant 0 : i32
    %c0_i32_1 = arith.constant 0 : i32
    return %c0_i32, %c0_i32_0 : i32, i32
  }
  func.func @transform_4(%arg0: i32) -> (i32, i32) {
    %c0_i32 = arith.constant 0 : i32
    %c0_i32_0 = arith.constant 0 : i32
    %c0_i32_1 = arith.constant 0 : i32
    return %c0_i32, %c0_i32_0 : i32, i32
  }
  func.func @transform_5(%arg0: i32) -> (i32, i32) {
    %c0_i32 = arith.constant 0 : i32
    %c0_i32_0 = arith.constant 0 : i32
    %c0_i32_1 = arith.constant 0 : i32
    return %c0_i32, %c0_i32_0 : i32, i32
  }
  func.func @transform_6(%arg0: i32) -> (i32, i32) {
    %c0_i32 = arith.constant 0 : i32
    %c0_i32_0 = arith.constant 0 : i32
    %c0_i32_1 = arith.constant 0 : i32
    return %c0_i32, %c0_i32_0 : i32, i32
  }
}

</mosaic_0001>

<bundles_post_ra>
// kernel: lstm_network_forward.1
= control target key start
LH: loop header
LB: loop body
LE: loop exit
PB: predicated region body
PF: predicated region fallthrough
CT: control target
= control target key end

     0   :  { %11 = vsyncpa [#allocation3], 0  ;;  %s816_s21 = smov [#allocation2]   ;;  %s935_s0 = inlined_call_operand.vmem [shape: bf16[32,16], index: 0, kind: input, shape index: {}]   ;;  %s936_s1 = inlined_call_operand.vmem [shape: f32[32,1], index: 1, kind: input, shape index: {}]   ;;  %s937_s2 = inlined_call_operand.vmem [shape: bf16[16,384], index: 2, kind: input, shape index: {}]   ;;  %s938_s3 = inlined_call_operand.vmem [shape: f32[1,384], index: 3, kind: input, shape index: {}]   ;;  %s939_s4 = inlined_call_operand.hbm [shape: bf16[128,384], index: 4, kind: input, shape index: {}]   ;;  %s940_s5 = inlined_call_operand.vmem [shape: f32[1,384], index: 5, kind: input, shape index: {}]   ;;  %s941_s6 = inlined_call_operand.vmem [shape: f32[32,128], index: 6, kind: output, shape index: {}]  }
   0x1   :  { %s25_s22 = sshll.u32 %s816_s21, 4  ;;  %s792_s25 = scalar_lea.hbm %s939_s4, 3072  ;;  %s26_s22 = int_to_ptr.vmem [resolvable:$true] %s25_s22 }
   0x2   :  { %p793_p0 = scmp.ne.s32.totalorder %s939_s4, %s792_s25  ;;  %p796_p1 = scmp.lt.u32.totalorder %s792_s25, %s939_s4 }
   0x4   :  { %p798_p2 = pnand %p796_p1, %p793_p0 }
   0x6   :  { %801 = shalt.err (!%p798_p2)
}
   0x7   :  { %s802_s30 = scalar_lea.vmem %s26_s22, 3072  ;;  %p807_p4 = scmp.lt.s32.totalorder %s26_s22, %s26_s22 }
   0x8   :  { %p803_p3 = scmp.ne.s32.totalorder %s26_s22, %s802_s30  ;;  %p808_p5 = scmp.lt.s32.totalorder %s802_s30, %s802_s30 }
   0xa   :  { %p809_p6 = por %p808_p5, %p807_p4 }
   0xc   :  { %p810_p7 = pnand %p809_p6, %p803_p3 }
   0xe   :  { %813 = shalt.err (!%p810_p7)
}
   0xf   :  { %s817_s7 = smov 192   ;;  %s818_s8 = smov 12  }
  0x10   :  { %31 = dma.hbm_to_vmem [thread:$0]  %s939_s4, 3072, %s26_s22, [#allocation3], %s817_s7, %s817_s7, %s818_s8  }
  0x11   :  { %814 = dma.done.wait [#allocation3], 3072  }
  0x12   :  { %815 = vsyncadd [#allocation3], 4294964224  ;;  %v819_v0 = vmov 0   ;;  %v690_v1 = vld [vmem:[%s937_s2 + $0x4] ss:$12 sps:$4 sm:$0xff]   ;;  %vm89_vm0 = vcmask 130048   ;;  %v48_v34 = vlaneseq }
  0x13   :  { %128 = vmatprep.mubr.bf16.mxu0 %v819_v0  ;;  %688 = vset.pattern.permute.xlu0 %v819_v0  ;;  %v692_v2 = vld [vmem:[%s937_s2] ss:$12 sps:$4 sm:$0xff]   ;;  %v693_v3 = vld [vmem:[%s937_s2 + $0x8] ss:$12 sps:$4 sm:$0xff]   ;;  %v701_v8 = vld [vmem:[#allocation2 + $0x1c] ss:$12 sps:$4 sm:$0xff]  }
  0x14   :  { %689 = vset.pattern.permute.xlu1 %v819_v0  ;;  %96 = vmatprep.subr.bf16.mxu0 %v690_v1  ;;  %v694_v4 = vld [vmem:[%s935_s0] sm:$0xff]   ;;  %v695_v5 = vld [vmem:[%s935_s0 + $0x8] sm:$0xff]   ;;  %v705_v11 = vld [vmem:[#allocation2 + $0x8] ss:$12 sps:$4 sm:$0xff]   ;;  %v899_v35 = vshrl.u32 %v48_v34, 7 }
  0x15   :  { %97 = vmatpush1.bf16.msra.mxu0 %v692_v2  ;;  %658 = vmatprep.subr.bf16.mxu1 %v693_v3  ;;  %v698_v6 = vld [vmem:[#allocation2 + $0x4] ss:$12 sps:$4 sm:$0xff]   ;;  %v696_v7 = vld [vmem:[#allocation2] ss:$12 sps:$4 sm:$0xff]   ;;  %v706_v15 = vld [vmem:[#allocation2 + $0x48] ss:$12 sps:$4 sm:$0xff]  }
  0x16   :  { %659 = vmatpush3.bf16.msra.mxu1 %v693_v3  ;;  %660 = vmatprep.mubr.msk.bf16.mxu1 %vm89_vm0, %v694_v4  ;;  %v699_v9 = vld [vmem:[#allocation2 + $0x18] ss:$12 sps:$4 sm:$0xff]   ;;  %v704_v10 = vld [vmem:[#allocation2 + $0x34] ss:$12 sps:$4 sm:$0xff]   ;;  %v702_v12 = vld [vmem:[#allocation2 + $0x30] ss:$12 sps:$4 sm:$0xff]  }
  0x17   :  { %425 = vmatprep.subr.bf16.mxu0 %v698_v6  ;;  %664 = vmatprep.subr.bf16.mxu1 %v705_v11  ;;  %v708_v13 = vld [vmem:[#allocation2 + $0x4c] ss:$12 sps:$4 sm:$0xff]   ;;  %v712_v16 = vld [vmem:[#allocation2 + $0x64] ss:$12 sps:$4 sm:$0xff]   ;;  %v716_v19 = vld [vmem:[#allocation2 + $0x7c] ss:$12 sps:$4 sm:$0xff]  }
  0x18   :  { %617 = vmatmul.mubr.msk.bf16.vlgmr.msra.gmra.mrb[0].mxu0 %vm89_vm0, %v694_v4  ;;  %v709_v14 = vld [vmem:[#allocation2 + $0x20] ss:$12 sps:$4 sm:$0xff]   ;;  %v713_v17 = vld [vmem:[#allocation2 + $0x38] ss:$12 sps:$4 sm:$0xff]   ;;  %v717_v20 = vld [vmem:[#allocation2 + $0x50] ss:$12 sps:$4 sm:$0xff]  }
  0x19   :  { %138 = vmatprep.mubr.bf16.mxu0 %v819_v0  ;;  %661 = vmatmul.mubr.msk.bf16.vlgmr.msra.gmra.mrb[0].mxu1 %vm89_vm0, %v695_v5  ;;  %v710_v18 = vld [vmem:[#allocation2 + $0x60] ss:$12 sps:$4 sm:$0xff]   ;;  %v714_v21 = vld [vmem:[#allocation2 + $0x78] ss:$12 sps:$4 sm:$0xff]   ;;  %v718_v22 = vld [vmem:[#allocation2 + $0x90] ss:$12 sps:$4 sm:$0xff]  }
  0x1a   :  { %426 = vmatpush1.bf16.msra.mxu0 %v696_v7  ;;  %665 = vmatpush3.bf16.msra.mxu1 %v705_v11  ;;  %v720_v23 = vld [vmem:[#allocation2 + $0x94] ss:$12 sps:$4 sm:$0xff]   ;;  %v724_v25 = vld [vmem:[#allocation2 + $0xac] ss:$12 sps:$4 sm:$0xff]   ;;  %v727_v29 = vld [vmem:[#allocation2 + $0xb0] ss:$12 sps:$4 sm:$0xff]  }
  0x1b   :  { %427 = vmatprep.subr.bf16.mxu0 %v701_v8  ;;  %666 = vmatprep.subr.bf16.mxu1 %v709_v14  ;;  %v721_v24 = vld [vmem:[#allocation2 + $0x68] ss:$12 sps:$4 sm:$0xff]   ;;  %v725_v26 = vld [vmem:[#allocation2 + $0x80] ss:$12 sps:$4 sm:$0xff]   ;;  %v726_v28 = vld [vmem:[#allocation2 + $0x98] ss:$12 sps:$4 sm:$0xff]  }
  0x1c   :  { %v722_v27 = vld [vmem:[#allocation2 + $0xa8] ss:$12 sps:$4 sm:$0xff]   ;;  %v575_v30 = vld [vmem:[%s936_s1] sm:$0xff]  ;;  %v576_v32 = vld [vmem:[%s936_s1 + $0x8] sm:$0xff]  ;;  %v50_v36 = vsub.s32 0, %v899_v35  ;;  %v54_v39 = vsub.s32 1, %v899_v35 }
  0x1d   :  { %v577_v31 = vld [vmem:[%s936_s1 + $0x10] sm:$0xff]  ;;  %581 = vperm.xlu0 %688, %v575_v30   ;;  %v578_v33 = vld [vmem:[%s936_s1 + $0x18] sm:$0xff]  ;;  %v46_v37 = vld [vmem:[%s938_s3] sm:$0x7]  ;;  %v58_v40 = vsub.s32 2, %v899_v35 }
  0x1e   :  { %428 = vmatpush1.bf16.msra.mxu0 %v699_v9  ;;  %667 = vmatpush3.bf16.msra.mxu1 %v709_v14  ;;  %v51_v38 = vrot.slane %v46_v37, %v50_v36  ;;  %v55_v44 = vrot.slane %v46_v37, %v54_v39 }
  0x1f   :  { %429 = vmatprep.subr.bf16.mxu0 %v704_v10  ;;  %668 = vmatprep.subr.bf16.mxu1 %v713_v17  ;;  %v59_v46 = vrot.slane %v46_v37, %v58_v40 }
  0x20   :  { %618 = vmatmul.mubr.msk.bf16.gmra.mrb[4].mxu0 %vm89_vm0, %v695_v5  ;;  %591 = vperm.xlu1 %689, %v577_v31  }
  0x21   :  { %457 = vmatprep.mubr.bf16.mxu0 %v819_v0  ;;  %586 = vperm.xlu0 %688, %v576_v32  }
  0x22   :  { %430 = vmatpush1.bf16.msra.mxu0 %v702_v12  ;;  %669 = vmatpush3.bf16.msra.mxu1 %v713_v17 }
  0x23   :  { %431 = vmatprep.subr.bf16.mxu0 %v708_v13  ;;  %670 = vmatprep.subr.bf16.mxu1 %v717_v20 }
  0x24   :  { %596 = vperm.xlu1 %689, %v578_v33  }
  0x26   :  { %432 = vmatpush1.bf16.msra.mxu0 %v706_v15  ;;  %671 = vmatpush3.bf16.msra.mxu1 %v717_v20 }
  0x27   :  { %433 = vmatprep.subr.bf16.mxu0 %v712_v16  ;;  %672 = vmatprep.subr.bf16.mxu1 %v721_v24 }
  0x2a   :  { %434 = vmatpush1.bf16.msra.mxu0 %v710_v18  ;;  %673 = vmatpush3.bf16.msra.mxu1 %v721_v24 }
  0x2b   :  { %435 = vmatprep.subr.bf16.mxu0 %v716_v19  ;;  %674 = vmatprep.subr.bf16.mxu1 %v725_v26 }
  0x2e   :  { %436 = vmatpush1.bf16.msra.mxu0 %v714_v21  ;;  %675 = vmatpush3.bf16.msra.mxu1 %v725_v26 }
  0x2f   :  { %437 = vmatprep.subr.bf16.mxu0 %v720_v23  ;;  %676 = vmatprep.subr.bf16.mxu1 %v726_v28 }
  0x32   :  { %438 = vmatpush1.bf16.msra.mxu0 %v718_v22  ;;  %677 = vmatpush3.bf16.msra.mxu1 %v726_v28 }
  0x33   :  { %439 = vmatprep.subr.bf16.mxu0 %v724_v25  ;;  %678 = vmatprep.subr.bf16.mxu1 %v727_v29 }
  0x36   :  { %440 = vmatpush1.bf16.msra.mxu0 %v722_v27  ;;  %679 = vmatpush3.bf16.msra.mxu1 %v727_v29 }
  0xeb   :  { %v130_v41 = vpop.f32.mrb[0].mxu0 }
  0xec   :  { %v131_v42 = vadd.f32 %v130_v41, %v51_v38  ;;  %v132_v43 = vpop.f32.mrb[1].mxu0  ;;  %v662_v47 = vpop.f32.mrb[0].mxu1 }
  0xed   :  { %v134_v45 = vpop.f32.mrb[2].mxu0  ;;  %v183_v51 = vpop.f32.mrb[1].mxu1  ;;  %v133_v55 = vadd.f32 %v132_v43, %v55_v44  ;;  %v192_v4 = vadd.f32 %v662_v47, %v59_v46 }
  0xee   :  { %v198_v48 = vmul.f32 0.5, %v131_v42  ;;  %v135_v49 = vadd.f32 %v134_v45, %v51_v38  ;;  %v136_v50 = vpop.f32.mrb[3].mxu0  ;;  %v663_v52 = vpop.f32.mrb[2].mxu1  ;;  %v184_v56 = vadd.f32 %v183_v51, %v59_v46 }
  0xef   :  { %v186_v54 = vpop.f32.mrb[3].mxu1  ;;  %v137_v59 = vadd.f32 %v136_v50, %v55_v44  ;;  %v199_v62 = vmul.f32 0.5, %v133_v55  ;;  %v195_v9 = vadd.f32 %v663_v52, %v59_v46 }
  0xf0   :  { %728 = vtanh.f32 %v198_v48  ;;  %v200_v53 = vmul.f32 0.5, %v135_v49  ;;  %v187_v57 = vadd.f32 %v186_v54, %v59_v46 }
  0xf1   :  { %v201_v5 = vmul.f32 0.5, %v137_v59 }
  0xf2   :  { %730 = vtanh.f32 %v200_v53 }
  0xf3   :  { %v140_v58 = vpop.f32.mrb[4].mxu0  ;;  %732 = vtanh.f32 %v184_v56 }
  0xf4   :  { %v141_v60 = vadd.f32 %v140_v58, %v51_v38  ;;  %v142_v61 = vpop.f32.mrb[5].mxu0  ;;  %734 = vtanh.f32 %v187_v57  ;;  %v280_v58 = vld [vmem:[%s940_s5] sm:$0x7] }
  0xf5   :  { %v144_v63 = vpop.f32.mrb[6].mxu0  ;;  %v143_v7 = vadd.f32 %v142_v61, %v55_v44  ;;  %v285_v59 = vrot.slane %v280_v58, %v50_v36 }
  0xf6   :  { %v202_v1 = vmul.f32 0.5, %v141_v60  ;;  %v145_v2 = vadd.f32 %v144_v63, %v51_v38  ;;  %v146_v3 = vpop.f32.mrb[7].mxu0  ;;  %v289_v63 = vrot.slane %v280_v58, %v54_v39 }
  0xf7   :  { %v147_v11 = vadd.f32 %v146_v3, %v55_v44  ;;  %v203_v15 = vmul.f32 0.5, %v143_v7 }
  0xf8   :  { %736 = vtanh.f32 %v202_v1  ;;  %v204_v6 = vmul.f32 0.5, %v145_v2 }
  0xf9   :  { %738 = vtanh.f32 %v199_v62  ;;  %v205_v18 = vmul.f32 0.5, %v147_v11 }
  0xfa   :  { %v729_v8 = vpop.eup %728  ;;  %740 = vtanh.f32 %v204_v6 }
  0xfb   :  { %v214_v10 = vmul.f32 0.5, %v729_v8  ;;  %742 = vtanh.f32 %v192_v4 }
  0xfc   :  { %v731_v12 = vpop.eup %730  ;;  %744 = vtanh.f32 %v201_v5  ;;  %v293_v5 = vrot.slane %v280_v58, %v58_v40  ;;  %v582_v58 = vpop.permute.xlu0 %581 }
  0xfd   :  { %v222_v13 = vadd.f32 0.5, %v214_v10  ;;  %v216_v14 = vmul.f32 0.5, %v731_v12  ;;  %746 = vtanh.f32 %v195_v9  ;;  %v733_v16 = vpop.eup %732 }
  0xfe   :  { %v735_v20 = vpop.eup %734  ;;  %748 = vtanh.f32 %v203_v15 }
  0xff   :  { %v224_v17 = vadd.f32 0.5, %v216_v14  ;;  %v234_v19 = vmul.f32 %v733_v16, %v222_v13 }
 0x101   :  { %750 = vtanh.f32 %v234_v19  ;;  %v235_v22 = vmul.f32 %v735_v20, %v224_v17 }
 0x102   :  { %v737_v21 = vpop.eup %736  ;;  %752 = vtanh.f32 %v205_v18 }
 0x103   :  { %v739_v23 = vpop.eup %738  ;;  %v218_v24 = vmul.f32 0.5, %v737_v21  ;;  %754 = vtanh.f32 %v235_v22 }
 0x104   :  { %v741_v25 = vpop.eup %740  ;;  %v215_v30 = vmul.f32 0.5, %v739_v23 }
 0x105   :  { %v743_v26 = vpop.eup %742  ;;  %v226_v27 = vadd.f32 0.5, %v218_v24  ;;  %v220_v28 = vmul.f32 0.5, %v741_v25 }
 0x106   :  { %v745_v29 = vpop.eup %744  ;;  %v223_v41 = vadd.f32 0.5, %v215_v30 }
 0x107   :  { %v236_v31 = vmul.f32 %v743_v26, %v226_v27  ;;  %v228_v32 = vadd.f32 0.5, %v220_v28  ;;  %v747_v33 = vpop.eup %746  ;;  %v217_v34 = vmul.f32 0.5, %v745_v29 }
 0x108   :  { %v749_v38 = vpop.eup %748 }
 0x109   :  { %756 = vtanh.f32 %v236_v31  ;;  %v237_v37 = vmul.f32 %v747_v33, %v228_v32  ;;  %v225_v44 = vadd.f32 0.5, %v217_v34  ;;  %v219_v47 = vmul.f32 0.5, %v749_v38 }
 0x10b   :  { %758 = vtanh.f32 %v237_v37  ;;  %v751_v42 = vpop.eup %750  ;;  %v227_v51 = vadd.f32 0.5, %v219_v47 }
 0x10c   :  { %v753_v43 = vpop.eup %752  ;;  %v242_v45 = vmul.f32 %v751_v42, %v223_v41 }
 0x10d   :  { %v755_v46 = vpop.eup %754  ;;  %v221_v49 = vmul.f32 0.5, %v753_v43 }
 0x10e   :  { %v243_v48 = vmul.f32 %v755_v46, %v225_v44 }
 0x10f   :  { %v229_v53 = vadd.f32 0.5, %v221_v49 }
 0x110   :  { %v246_v50 = vpack.c.bf16 %v243_v48, %v242_v45 }
 0x112   :  { %458 = vmatmul.mubr.bf16.vlgmr.msra.gmra.mrb[8].mxu0 %v246_v50  ;;  %680 = vmatprep.mubr.bf16.mxu1 %v246_v50 }
 0x113   :  { %v757_v52 = vpop.eup %756  ;;  %467 = vmatprep.mubr.bf16.mxu0 %v819_v0 }
 0x114   :  { %v244_v54 = vmul.f32 %v757_v52, %v227_v51 }
 0x115   :  { %v759_v55 = vpop.eup %758 }
 0x116   :  { %v245_v56 = vmul.f32 %v759_v55, %v229_v53 }
 0x118   :  { %v247_v57 = vpack.c.bf16 %v245_v56, %v244_v54 }
 0x11a   :  { %681 = vmatmul.mubr.bf16.vlgmr.msra.gmra.mrb[4].mxu1 %v247_v57  ;;  %468 = vmatmul.mubr.bf16.gmra.mrb[12].mxu0 %v247_v57 }
 0x1e5   :  { %v459_v60 = vpop.f32.mrb[8].mxu0 }
 0x1e6   :  { %v460_v61 = vadd.f32 %v459_v60, %v285_v59  ;;  %v461_v62 = vpop.f32.mrb[9].mxu0 }
 0x1e7   :  { %v463_v0 = vpop.f32.mrb[10].mxu0  ;;  %v462_v6 = vadd.f32 %v461_v62, %v289_v63 }
 0x1e8   :  { %v527_v1 = vmul.f32 0.5, %v460_v61  ;;  %v464_v2 = vadd.f32 %v463_v0, %v285_v59  ;;  %v465_v3 = vpop.f32.mrb[11].mxu0 }
 0x1e9   :  { %v528_v13 = vmul.f32 0.5, %v462_v6  ;;  %v466_v19 = vadd.f32 %v465_v3, %v289_v63 }
 0x1ea   :  { %760 = vtanh.f32 %v527_v1  ;;  %v529_v4 = vmul.f32 0.5, %v464_v2 }
 0x1eb   :  { %v530_v25 = vmul.f32 0.5, %v466_v19 }
 0x1ec   :  { %762 = vtanh.f32 %v529_v4 }
 0x1ed   :  { %v682_v7 = vpop.f32.mrb[4].mxu1  ;;  %v469_v8 = vpop.f32.mrb[12].mxu0 }
 0x1ee   :  { %v512_v9 = vpop.f32.mrb[5].mxu1  ;;  %v470_v36 = vadd.f32 %v469_v8, %v285_v59  ;;  %v471_v10 = vpop.f32.mrb[13].mxu0  ;;  %v521_v18 = vadd.f32 %v682_v7, %v293_v5 }
 0x1ef   :  { %v513_v11 = vadd.f32 %v512_v9, %v293_v5  ;;  %v683_v12 = vpop.f32.mrb[6].mxu1  ;;  %v473_v39 = vpop.f32.mrb[14].mxu0  ;;  %v472_v20 = vadd.f32 %v471_v10, %v289_v63 }
 0x1f0   :  { %v515_v14 = vpop.f32.mrb[7].mxu1  ;;  %v531_v15 = vmul.f32 0.5, %v470_v36  ;;  %v474_v16 = vadd.f32 %v473_v39, %v285_v59  ;;  %v475_v17 = vpop.f32.mrb[15].mxu0  ;;  %v524_v22 = vadd.f32 %v683_v12, %v293_v5 }
 0x1f1   :  { %764 = vtanh.f32 %v513_v11  ;;  %v516_v40 = vadd.f32 %v515_v14, %v293_v5  ;;  %v476_v23 = vadd.f32 %v475_v17, %v289_v63  ;;  %v532_v26 = vmul.f32 0.5, %v472_v20  ;;  %v592_v63 = vpop.permute.xlu1 %591  ;;  %v587_v5 = vpop.permute.xlu0 %586 }
 0x1f2   :  { %766 = vtanh.f32 %v531_v15  ;;  %v533_v35 = vmul.f32 0.5, %v474_v16 }
 0x1f3   :  { %768 = vtanh.f32 %v528_v13  ;;  %v534_v28 = vmul.f32 0.5, %v476_v23 }
 0x1f4   :  { %v761_v21 = vpop.eup %760  ;;  %770 = vtanh.f32 %v533_v35 }
 0x1f5   :  { %v543_v24 = vmul.f32 0.5, %v761_v21  ;;  %772 = vtanh.f32 %v521_v18  ;;  %v597_v11 = vpop.permute.xlu1 %596 }
 0x1f6   :  { %774 = vtanh.f32 %v516_v40  ;;  %v763_v27 = vpop.eup %762 }
 0x1f7   :  { %776 = vtanh.f32 %v524_v22  ;;  %v551_v29 = vadd.f32 0.5, %v543_v24  ;;  %v545_v31 = vmul.f32 0.5, %v763_v27 }
 0x1f8   :  { %778 = vtanh.f32 %v530_v25 }
 0x1f9   :  { %780 = vtanh.f32 %v532_v26  ;;  %v553_v42 = vadd.f32 0.5, %v545_v31 }
 0x1fa   :  { %782 = vtanh.f32 %v534_v28 }
 0x1fb   :  { %v765_v30 = vpop.eup %764 }
 0x1fc   :  { %v563_v32 = vmul.f32 %v765_v30, %v551_v29  ;;  %v767_v33 = vpop.eup %766 }
 0x1fd   :  { %v769_v34 = vpop.eup %768  ;;  %v547_v37 = vmul.f32 0.5, %v767_v33 }
 0x1fe   :  { %784 = vtanh.f32 %v563_v32  ;;  %v771_v38 = vpop.eup %770  ;;  %v544_v50 = vmul.f32 0.5, %v769_v34 }
 0x1ff   :  { %v773_v41 = vpop.eup %772  ;;  %v555_v43 = vadd.f32 0.5, %v547_v37  ;;  %v549_v44 = vmul.f32 0.5, %v771_v38 }
 0x200   :  { %v775_v45 = vpop.eup %774  ;;  %v552_v55 = vadd.f32 0.5, %v544_v50 }
 0x201   :  { %v565_v46 = vmul.f32 %v773_v41, %v555_v43  ;;  %v557_v47 = vadd.f32 0.5, %v549_v44  ;;  %v564_v48 = vmul.f32 %v775_v45, %v553_v42  ;;  %v777_v49 = vpop.eup %776 }
 0x202   :  { %v779_v52 = vpop.eup %778 }
 0x203   :  { %786 = vtanh.f32 %v565_v46  ;;  %v566_v51 = vmul.f32 %v777_v49, %v557_v47  ;;  %v781_v53 = vpop.eup %780  ;;  %v546_v60 = vmul.f32 0.5, %v779_v52 }
 0x204   :  { %788 = vtanh.f32 %v564_v48  ;;  %v783_v54 = vpop.eup %782  ;;  %v548_v57 = vmul.f32 0.5, %v781_v53 }
 0x205   :  { %790 = vtanh.f32 %v566_v51  ;;  %v550_v61 = vmul.f32 0.5, %v783_v54  ;;  %v554_v2 = vadd.f32 0.5, %v546_v60 }
 0x206   :  { %v556_v0 = vadd.f32 0.5, %v548_v57 }
 0x207   :  { %v558_v6 = vadd.f32 0.5, %v550_v61 }
 0x208   :  { %v785_v56 = vpop.eup %784 }
 0x209   :  { %v571_v59 = vmul.f32 %v785_v56, %v552_v55 }
 0x20b   :  { %v599_v62 = vmul.f32 %v582_v58, %v571_v59 }
 0x20d   :  { %603 = vst [vmem:[%s941_s6] sm:$0xff] %v599_v62  ;;  %v787_v1 = vpop.eup %786 }
 0x20e   :  { %v789_v3 = vpop.eup %788  ;;  %v573_v4 = vmul.f32 %v787_v1, %v556_v0 }
 0x20f   :  { %v791_v7 = vpop.eup %790  ;;  %v572_v8 = vmul.f32 %v789_v3, %v554_v2 }
 0x210   :  { %v601_v9 = vmul.f32 %v592_v63, %v573_v4  ;;  %v574_v36 = vmul.f32 %v791_v7, %v558_v6 }
 0x211   :  { %v600_v10 = vmul.f32 %v587_v5, %v572_v8 }
 0x212   :  { %605 = vst [vmem:[%s941_s6 + $0x10] sm:$0xff] %v601_v9  ;;  %v602_v12 = vmul.f32 %v597_v11, %v574_v36 }
 0x213   :  { %604 = vst [vmem:[%s941_s6 + $0x8] sm:$0xff] %v600_v10 }
 0x214   :  { %606 = vst [vmem:[%s941_s6 + $0x18] sm:$0xff] %v602_v12 }
 0x215   :  { %611 = vsyncpa [#allocation3], 1 }

</bundles_post_ra>
